<compile_context>
chip_gen: v5e
topology: v5e:2x2
jax: 0.10.0
libtpu: 0.0.40
codegen_flags: <defaults>
</compile_context>

<pallas_src>
import functools

import jax
import jax.numpy as jnp
from jax.experimental import pallas as pl
from jax.experimental.pallas import tpu as pltpu

BN_EPS = 1e-5
LANE = 128
SUBLANE = 8


def _round_up(x, m):
    return (x + m - 1) // m * m


def _full_spec(shape):
    # Whole-array block at grid=(); index_map takes no grid args.
    return pl.BlockSpec(shape, lambda: tuple(0 for _ in shape))


def _vmem_budget(byte_counts, n_pad, width_pad):
    """Scoped-VMEM limit: resident arrays + a few f32 temporaries, 2x headroom."""
    resident = sum(int(b) for b in byte_counts)
    temporaries = 4 * (n_pad * width_pad * 4)  # h, z, z*z, scaled copies (f32)
    return min(2 * (resident + temporaries) + (8 << 20), 64 << 20)


# -----------------------------------------------------------------------------
# Kernels
# -----------------------------------------------------------------------------
def _gin_mlp_fused_kernel(*refs, num_layers, n_rows, n_rows_padded, hid_pad,
                          mm_dtype):
    """All layers fused: (linear -> BN(batch stats) -> relu) x (L-1) -> linear.

    refs = [x, W0, W1, ..., W_{L-1}, b_last, gamma_stack, beta_stack, out]
    Weights are pre-transposed (in_pad_i, out_pad_i) slabs in `mm_dtype`.
    """
    x_ref = refs[0]
    w_refs = refs[1:1 + num_layers]
    b_last_ref = refs[1 + num_layers]
    g_ref = refs[2 + num_layers]
    beta_ref = refs[3 + num_layers]
    o_ref = refs[4 + num_layers]

    inv_n = jnp.float32(1.0 / n_rows)

    # Hoisted row mask: built once (single iota + compare), applied as one
    # vmul per layer.  Only needed when rows were padded to a sublane multiple.
    row_mask = None
    if n_rows_padded != n_rows:
        row_ids = jax.lax.broadcasted_iota(jnp.int32, (n_rows_padded, hid_pad), 0)
        row_mask = (row_ids < n_rows).astype(jnp.float32)

    h = x_ref[...]                                    # (Npad, in_pad), f32
    for i in range(num_layers - 1):
        # Linear (bias dropped: exactly cancelled by the BN mean subtraction).
        # bf16 operands into the MXU, f32 accumulation.
        z = jnp.dot(h.astype(mm_dtype), w_refs[i][...],
                    preferred_element_type=jnp.float32)

        # BatchNorm1d training-mode stats (biased variance).  Padded rows of z
        # are exactly zero (zero x rows, no bias), so they contribute nothing.
        mean = jnp.sum(z, axis=0, keepdims=True) * inv_n
        ex2 = jnp.sum(z * z, axis=0, keepdims=True) * inv_n
        var = jnp.maximum(ex2 - mean * mean, 0.0)     # clamp: cancellation guard

        # Fold gamma / rsqrt / mean / beta into one scale + shift (rsqrt on EUP).
        scale = g_ref[i] * jax.lax.rsqrt(var + BN_EPS)
        shift = beta_ref[i] - scale * mean
        h = jnp.maximum(z * scale + shift, 0.0)

        if row_mask is not None:
            # Keep padded rows at zero so they never pollute later batch stats.
            h = h * row_mask

    # Final linear (keeps its bias).
    o_ref[...] = (
        jnp.dot(h.astype(mm_dtype), w_refs[num_layers - 1][...],
                preferred_element_type=jnp.float32)
        + b_last_ref[...]
    )


def _linear_kernel(x_ref, w_ref, b_ref, o_ref, *, mm_dtype):
    """num_layers == 1 path: y = x @ W.T + b (W.T pre-packed, mm_dtype)."""
    o_ref[...] = (
        jnp.dot(x_ref[...].astype(mm_dtype), w_ref[...],
                preferred_element_type=jnp.float32)
        + b_ref[...]
    )


# -----------------------------------------------------------------------------
# Parameter init (mirrors nn.Linear uniform init + BatchNorm ones/zeros)
# -----------------------------------------------------------------------------
def init_gin_mlp_params(key, num_layers, input_dim, hidden_dim, output_dim):
    if num_layers < 1:
        raise ValueError("number of layers should be positive!")

    params = {"num_layers": num_layers, "linears": [], "norms": []}

    def init_linear(k, fan_in, fan_out):
        k1, k2 = jax.random.split(k)
        bound = 1.0 / jnp.sqrt(jnp.float32(fan_in))
        w = jax.random.uniform(k1, (fan_out, fan_in), jnp.float32, -bound, bound)
        b = jax.random.uniform(k2, (fan_out,), jnp.float32, -bound, bound)
        return w, b

    if num_layers == 1:
        key, sub = jax.random.split(key)
        params["linears"].append(init_linear(sub, input_dim, output_dim))
        return params

    dims = [input_dim] + [hidden_dim] * (num_layers - 1) + [output_dim]
    for i in range(num_layers):
        key, sub = jax.random.split(key)
        params["linears"].append(init_linear(sub, dims[i], dims[i + 1]))
    for _ in range(num_layers - 1):
        params["norms"].append(
            (jnp.ones((hidden_dim,), jnp.float32),
             jnp.zeros((hidden_dim,), jnp.float32))
        )
    return params


def pack_gin_mlp_params(raw, matmul_dtype=jnp.bfloat16):
    """One-time packing: pre-transpose, per-layer zero-pad to lane multiples,
    cast weight slabs to the MXU dtype (default bf16)."""
    L = raw["num_layers"]
    linears = raw["linears"]

    input_dim = int(linears[0][0].shape[1])
    output_dim = int(linears[-1][0].shape[0])
    in_pad = _round_up(input_dim, LANE)
    out_pad = _round_up(output_dim, LANE)

    packed = {
        "num_layers": L,
        "matmul_dtype": matmul_dtype,
        "input_dim": input_dim,
        "output_dim": output_dim,
        "in_pad": in_pad,
        "out_pad": out_pad,
    }

    if L == 1:
        w, b = linears[0]
        w_p = (jnp.zeros((in_pad, out_pad), jnp.float32)
               .at[:input_dim, :output_dim].set(w.T)).astype(matmul_dtype)
        b_p = jnp.zeros((1, out_pad), jnp.float32).at[0, :output_dim].set(b)
        packed.update({"weights": [w_p], "b_last": b_p})
        return packed

    hidden_dim = int(linears[0][0].shape[0])
    hid_pad = _round_up(hidden_dim, LANE)
    packed["hid_pad"] = hid_pad

    dims_in = [input_dim] + [hidden_dim] * (L - 1)
    dims_out = [hidden_dim] * (L - 1) + [output_dim]
    pads_in = [in_pad] + [hid_pad] * (L - 1)
    pads_out = [hid_pad] * (L - 1) + [out_pad]

    weights = []
    for i, (w, _) in enumerate(linears):
        w_p = (jnp.zeros((pads_in[i], pads_out[i]), jnp.float32)
               .at[:dims_in[i], :dims_out[i]].set(w.T)).astype(matmul_dtype)
        weights.append(w_p)

    _, b_last_raw = linears[-1]
    b_last = jnp.zeros((1, out_pad), jnp.float32).at[0, :output_dim].set(b_last_raw)

    g_stack = jnp.zeros((L - 1, 1, hid_pad), jnp.float32)
    beta_stack = jnp.zeros((L - 1, 1, hid_pad), jnp.float32)
    for i, (gamma, beta) in enumerate(raw["norms"]):
        hd = gamma.shape[0]
        g_stack = g_stack.at[i, 0, :hd].set(gamma)
        beta_stack = beta_stack.at[i, 0, :hd].set(beta)

    packed.update({
        "weights": weights,
        "b_last": b_last,
        "g_stack": g_stack,
        "beta_stack": beta_stack,
    })
    return packed


# -----------------------------------------------------------------------------
# Forward (single pallas_call)
# -----------------------------------------------------------------------------
def gin_mlp_forward(packed, x):
    L = packed["num_layers"]
    in_pad = packed["in_pad"]
    out_pad = packed["out_pad"]
    n, in_dim = x.shape
    n_pad = _round_up(max(n, SUBLANE), SUBLANE)

    # Pad features to lane multiple, rows to sublane multiple.  (For graph-
    # scale N this wrapper copy should be replaced by a row-gridded kernel.)
    x_pad = jnp.zeros((n_pad, in_pad), jnp.float32).at[:n, :in_dim].set(x)

    if L == 1:
        w, b = packed["weights"][0], packed["b_last"]
        vmem_bytes = _vmem_budget(
            [x_pad.nbytes, w.nbytes, b.nbytes, n_pad * out_pad * 4], n_pad, out_pad)
        out_padded = pl.pallas_call(
            functools.partial(_linear_kernel, mm_dtype=packed["matmul_dtype"]),
            out_shape=jax.ShapeDtypeStruct((n_pad, out_pad), jnp.float32),
            grid=(),
            in_specs=[_full_spec(x_pad.shape), _full_spec(w.shape),
                      _full_spec(b.shape)],
            out_specs=_full_spec((n_pad, out_pad)),
            compiler_params=pltpu.CompilerParams(vmem_limit_bytes=vmem_bytes),
        )(x_pad, w, b)
    else:
        hid_pad = packed["hid_pad"]
        args = [x_pad, *packed["weights"], packed["b_last"],
                packed["g_stack"], packed["beta_stack"]]
        vmem_bytes = _vmem_budget(
            [a.nbytes for a in args] + [n_pad * out_pad * 4], n_pad, hid_pad)
        kern = functools.partial(
            _gin_mlp_fused_kernel,
            num_layers=L, n_rows=n, n_rows_padded=n_pad, hid_pad=hid_pad,
            mm_dtype=packed["matmul_dtype"],
        )
        out_padded = pl.pallas_call(
            kern,
            out_shape=jax.ShapeDtypeStruct((n_pad, out_pad), jnp.float32),
            grid=(),
            in_specs=[_full_spec(a.shape) for a in args],
            out_specs=_full_spec((n_pad, out_pad)),
            compiler_params=pltpu.CompilerParams(vmem_limit_bytes=vmem_bytes),
        )(*args)

    return out_padded[:n, :packed["output_dim"]]


# -----------------------------------------------------------------------------
# Pure-JAX reference (uses the raw, un-packed f32 params — includes all biases)
# -----------------------------------------------------------------------------
def gin_mlp_reference(params, x):
    num_layers = params["num_layers"]
    if num_layers == 1:
        w, b = params["linears"][0]
        return x @ w.T + b
    h = x
    for i in range(num_layers - 1):
        w, b = params["linears"][i]
        gamma, beta = params["norms"][i]
        h = h @ w.T + b
        mean = jnp.mean(h, axis=0, keepdims=True)
        var = jnp.mean((h - mean) ** 2, axis=0, keepdims=True)
        h = gamma * (h - mean) / jnp.sqrt(var + BN_EPS) + beta
        h = jnp.maximum(h, 0.0)
    w, b = params["linears"][-1]
    return h @ w.T + b


if __name__ == "__main__":
    key = jax.random.PRNGKey(0)
    k_param, k_x = jax.random.split(key)

    num_layers = 3
    N, input_dim, hidden_dim, output_dim = 8, 16, 32, 8

    raw = init_gin_mlp_params(k_param, num_layers, input_dim, hidden_dim, output_dim)
    x = jax.random.normal(k_x, (N, input_dim), dtype=jnp.float32)
    ref = gin_mlp_reference(raw, x)

    # bf16-MXU path (default / production config): f32 accumulation, f32 BN.
    packed_bf16 = pack_gin_mlp_params(raw, matmul_dtype=jnp.bfloat16)
    out_bf16 = jax.block_until_ready(gin_mlp_forward(packed_bf16, x))
    assert out_bf16.shape == (N, output_dim)
    assert jnp.allclose(out_bf16, ref, atol=5e-2, rtol=5e-2), \
        "mismatch vs reference (MLP, bf16 MXU)"

    # f32-MXU path: validates kernel structure at tight tolerance.
    packed_f32 = pack_gin_mlp_params(raw, matmul_dtype=jnp.float32)
    out_f32 = jax.block_until_ready(gin_mlp_forward(packed_f32, x))
    assert jnp.allclose(out_f32, ref, atol=1e-4, rtol=1e-4), \
        "mismatch vs reference (MLP, f32)"

    # num_layers == 1 (pure linear) path.
    raw1 = init_gin_mlp_params(k_param, 1, input_dim, hidden_dim, output_dim)
    packed1 = pack_gin_mlp_params(raw1, matmul_dtype=jnp.float32)
    out1 = jax.block_until_ready(gin_mlp_forward(packed1, x))
    ref1 = gin_mlp_reference(raw1, x)
    assert out1.shape == (N, output_dim)
    assert jnp.allclose(out1, ref1, atol=1e-4, rtol=1e-4), \
        "mismatch vs reference (linear)"

    print("KERNEL_OK")
</pallas_src>

<mosaic_0001>
module attributes {stable_mosaic.version = 11 : i64} {
  func.func @_gin_mlp_fused_kernel(%arg0: memref<8x128xf32, #tpu.memory_space<vmem>>, %arg1: memref<128x128xbf16, #tpu.memory_space<vmem>>, %arg2: memref<128x128xbf16, #tpu.memory_space<vmem>>, %arg3: memref<128x128xbf16, #tpu.memory_space<vmem>>, %arg4: memref<1x128xf32, #tpu.memory_space<vmem>>, %arg5: memref<2x1x128xf32, #tpu.memory_space<vmem>>, %arg6: memref<2x1x128xf32, #tpu.memory_space<vmem>>, %arg7: memref<8x128xf32, #tpu.memory_space<vmem>>) attributes {dimension_semantics = [], scalar_prefetch = 0 : i64, scratch_operands = 0 : i64, tpu.core_type = #tpu.core_type<tc>} {
    %c0 = arith.constant 0 : index
    %c0_0 = arith.constant 0 : index
    %0 = vector.load %arg0[%c0, %c0_0] : memref<8x128xf32, #tpu.memory_space<vmem>>, vector<8x128xf32>
    %1 = arith.truncf %0 : vector<8x128xf32> to vector<8x128xbf16>
    %c0_1 = arith.constant 0 : index
    %c0_2 = arith.constant 0 : index
    %2 = vector.load %arg1[%c0_1, %c0_2] : memref<128x128xbf16, #tpu.memory_space<vmem>>, vector<128x128xbf16>
    %cst = arith.constant dense<0.000000e+00> : vector<8x128xf32>
    %3 = tpu.matmul %1, %2, %cst {dimension_numbers = #tpu.dot_dimension_numbers<[1], [0], [0], [1], [0, 0, 1, 1], [], []>} : vector<8x128xbf16>, vector<128x128xbf16>, vector<8x128xf32> -> vector<8x128xf32>
    %cst_3 = arith.constant dense<0.000000e+00> : vector<128xf32>
    %4 = vector.multi_reduction <add>, %3, %cst_3 [0] : vector<8x128xf32> to vector<128xf32>
    %5 = vector.shape_cast %4 : vector<128xf32> to vector<1x128xf32>
    %cst_4 = arith.constant 1.250000e-01 : f32
    %6 = vector.broadcast %cst_4 : f32 to vector<1x128xf32>
    %7 = arith.mulf %5, %6 : vector<1x128xf32>
    %8 = arith.mulf %3, %3 : vector<8x128xf32>
    %cst_5 = arith.constant dense<0.000000e+00> : vector<128xf32>
    %9 = vector.multi_reduction <add>, %8, %cst_5 [0] : vector<8x128xf32> to vector<128xf32>
    %10 = vector.shape_cast %9 : vector<128xf32> to vector<1x128xf32>
    %cst_6 = arith.constant 1.250000e-01 : f32
    %11 = vector.broadcast %cst_6 : f32 to vector<1x128xf32>
    %12 = arith.mulf %10, %11 : vector<1x128xf32>
    %13 = arith.mulf %7, %7 : vector<1x128xf32>
    %14 = arith.subf %12, %13 : vector<1x128xf32>
    %cst_7 = arith.constant 0.000000e+00 : f32
    %15 = vector.broadcast %cst_7 : f32 to vector<1x128xf32>
    %16 = arith.maximumf %14, %15 : vector<1x128xf32>
    %c0_8 = arith.constant 0 : index
    %c0_9 = arith.constant 0 : index
    %c0_10 = arith.constant 0 : index
    %17 = vector.load %arg5[%c0_8, %c0_9, %c0_10] : memref<2x1x128xf32, #tpu.memory_space<vmem>>, vector<1x1x128xf32>
    %18 = vector.shape_cast %17 : vector<1x1x128xf32> to vector<1x128xf32>
    %cst_11 = arith.constant 9.99999974E-6 : f32
    %19 = vector.broadcast %cst_11 : f32 to vector<1x128xf32>
    %20 = arith.addf %16, %19 : vector<1x128xf32>
    %21 = math.rsqrt %20 : vector<1x128xf32>
    %22 = arith.mulf %18, %21 : vector<1x128xf32>
    %c0_12 = arith.constant 0 : index
    %c0_13 = arith.constant 0 : index
    %c0_14 = arith.constant 0 : index
    %23 = vector.load %arg6[%c0_12, %c0_13, %c0_14] : memref<2x1x128xf32, #tpu.memory_space<vmem>>, vector<1x1x128xf32>
    %24 = vector.shape_cast %23 : vector<1x1x128xf32> to vector<1x128xf32>
    %25 = arith.mulf %22, %7 : vector<1x128xf32>
    %26 = arith.subf %24, %25 : vector<1x128xf32>
    %27 = vector.broadcast %22 : vector<1x128xf32> to vector<8x128xf32>
    %28 = arith.mulf %3, %27 : vector<8x128xf32>
    %29 = vector.broadcast %26 : vector<1x128xf32> to vector<8x128xf32>
    %30 = arith.addf %28, %29 : vector<8x128xf32>
    %cst_15 = arith.constant 0.000000e+00 : f32
    %31 = vector.broadcast %cst_15 : f32 to vector<8x128xf32>
    %32 = arith.maximumf %30, %31 : vector<8x128xf32>
    %33 = arith.truncf %32 : vector<8x128xf32> to vector<8x128xbf16>
    %c0_16 = arith.constant 0 : index
    %c0_17 = arith.constant 0 : index
    %34 = vector.load %arg2[%c0_16, %c0_17] : memref<128x128xbf16, #tpu.memory_space<vmem>>, vector<128x128xbf16>
    %cst_18 = arith.constant dense<0.000000e+00> : vector<8x128xf32>
    %35 = tpu.matmul %33, %34, %cst_18 {dimension_numbers = #tpu.dot_dimension_numbers<[1], [0], [0], [1], [0, 0, 1, 1], [], []>} : vector<8x128xbf16>, vector<128x128xbf16>, vector<8x128xf32> -> vector<8x128xf32>
    %cst_19 = arith.constant dense<0.000000e+00> : vector<128xf32>
    %36 = vector.multi_reduction <add>, %35, %cst_19 [0] : vector<8x128xf32> to vector<128xf32>
    %37 = vector.shape_cast %36 : vector<128xf32> to vector<1x128xf32>
    %cst_20 = arith.constant 1.250000e-01 : f32
    %38 = vector.broadcast %cst_20 : f32 to vector<1x128xf32>
    %39 = arith.mulf %37, %38 : vector<1x128xf32>
    %40 = arith.mulf %35, %35 : vector<8x128xf32>
    %cst_21 = arith.constant dense<0.000000e+00> : vector<128xf32>
    %41 = vector.multi_reduction <add>, %40, %cst_21 [0] : vector<8x128xf32> to vector<128xf32>
    %42 = vector.shape_cast %41 : vector<128xf32> to vector<1x128xf32>
    %cst_22 = arith.constant 1.250000e-01 : f32
    %43 = vector.broadcast %cst_22 : f32 to vector<1x128xf32>
    %44 = arith.mulf %42, %43 : vector<1x128xf32>
    %45 = arith.mulf %39, %39 : vector<1x128xf32>
    %46 = arith.subf %44, %45 : vector<1x128xf32>
    %cst_23 = arith.constant 0.000000e+00 : f32
    %47 = vector.broadcast %cst_23 : f32 to vector<1x128xf32>
    %48 = arith.maximumf %46, %47 : vector<1x128xf32>
    %c1 = arith.constant 1 : index
    %c0_24 = arith.constant 0 : index
    %c0_25 = arith.constant 0 : index
    %49 = vector.load %arg5[%c1, %c0_24, %c0_25] : memref<2x1x128xf32, #tpu.memory_space<vmem>>, vector<1x1x128xf32>
    %50 = vector.shape_cast %49 : vector<1x1x128xf32> to vector<1x128xf32>
    %cst_26 = arith.constant 9.99999974E-6 : f32
    %51 = vector.broadcast %cst_26 : f32 to vector<1x128xf32>
    %52 = arith.addf %48, %51 : vector<1x128xf32>
    %53 = math.rsqrt %52 : vector<1x128xf32>
    %54 = arith.mulf %50, %53 : vector<1x128xf32>
    %c1_27 = arith.constant 1 : index
    %c0_28 = arith.constant 0 : index
    %c0_29 = arith.constant 0 : index
    %55 = vector.load %arg6[%c1_27, %c0_28, %c0_29] : memref<2x1x128xf32, #tpu.memory_space<vmem>>, vector<1x1x128xf32>
    %56 = vector.shape_cast %55 : vector<1x1x128xf32> to vector<1x128xf32>
    %57 = arith.mulf %54, %39 : vector<1x128xf32>
    %58 = arith.subf %56, %57 : vector<1x128xf32>
    %59 = vector.broadcast %54 : vector<1x128xf32> to vector<8x128xf32>
    %60 = arith.mulf %35, %59 : vector<8x128xf32>
    %61 = vector.broadcast %58 : vector<1x128xf32> to vector<8x128xf32>
    %62 = arith.addf %60, %61 : vector<8x128xf32>
    %cst_30 = arith.constant 0.000000e+00 : f32
    %63 = vector.broadcast %cst_30 : f32 to vector<8x128xf32>
    %64 = arith.maximumf %62, %63 : vector<8x128xf32>
    %65 = arith.truncf %64 : vector<8x128xf32> to vector<8x128xbf16>
    %c0_31 = arith.constant 0 : index
    %c0_32 = arith.constant 0 : index
    %66 = vector.load %arg3[%c0_31, %c0_32] : memref<128x128xbf16, #tpu.memory_space<vmem>>, vector<128x128xbf16>
    %cst_33 = arith.constant dense<0.000000e+00> : vector<8x128xf32>
    %67 = tpu.matmul %65, %66, %cst_33 {dimension_numbers = #tpu.dot_dimension_numbers<[1], [0], [0], [1], [0, 0, 1, 1], [], []>} : vector<8x128xbf16>, vector<128x128xbf16>, vector<8x128xf32> -> vector<8x128xf32>
    %c0_34 = arith.constant 0 : index
    %c0_35 = arith.constant 0 : index
    %68 = vector.load %arg4[%c0_34, %c0_35] : memref<1x128xf32, #tpu.memory_space<vmem>>, vector<1x128xf32>
    %69 = vector.broadcast %68 : vector<1x128xf32> to vector<8x128xf32>
    %70 = arith.addf %67, %69 : vector<8x128xf32>
    %c0_36 = arith.constant 0 : index
    %c0_37 = arith.constant 0 : index
    %71 = vector.load %arg7[%c0_36, %c0_37] : memref<8x128xf32, #tpu.memory_space<vmem>>, vector<8x128xf32>
    tpu.vector_store %arg7[%c0_36, %c0_37], %70 {strides = array<i32>} : memref<8x128xf32, #tpu.memory_space<vmem>>, vector<8x128xf32>,
    return
  }
}

</mosaic_0001>

<bundles_post_ra>
// kernel: tpu_custom_call.1
= control target key start
LH: loop header
LB: loop body
LE: loop exit
PB: predicated region body
PF: predicated region fallthrough
CT: control target
= control target key end

     0   :  { %12 = vsyncpa [#allocation3], 0  ;;  %s813_s0 = inlined_call_operand.hbm [shape: f32[8,128], index: 0, kind: input, shape index: {}]   ;;  %s814_s1 = inlined_call_operand.hbm [shape: bf16[128,128], index: 1, kind: input, shape index: {}]   ;;  %s815_s2 = inlined_call_operand.hbm [shape: bf16[128,128], index: 2, kind: input, shape index: {}]   ;;  %s816_s3 = inlined_call_operand.hbm [shape: bf16[128,128], index: 3, kind: input, shape index: {}]   ;;  %s817_s4 = inlined_call_operand.hbm [shape: f32[1,128], index: 4, kind: input, shape index: {}]   ;;  %s818_s5 = inlined_call_operand.vmem [shape: f32[2,1,128], index: 5, kind: input, shape index: {}]   ;;  %s819_s6 = inlined_call_operand.vmem [shape: f32[2,1,128], index: 6, kind: input, shape index: {}]   ;;  %s820_s7 = inlined_call_operand.hbm [shape: f32[8,128], index: 7, kind: output, shape index: {}]  }
   0x1   :  { %13 = vsyncpa [#allocation6], 0 }
   0x2   :  { %14 = vsyncpa [#allocation9], 0  ;;  %s31_s26 = sshll.u32 %s814_s1, 4  ;;  %s32_s26 = int_to_ptr.hbm [resolvable:$true] %s31_s26 }
   0x3   :  { %15 = vsyncpa [#allocation4], 0  ;;  %s735_s27 = smov [#allocation5]   ;;  %s57_s8 = sshll.u32 %s816_s3, 4  ;;  %s58_s8 = int_to_ptr.hbm [resolvable:$true] %s57_s8 }
   0x4   :  { %s33_s28 = sshll.u32 %s735_s27, 4  ;;  %s736_s9 = smov 64   ;;  %s34_s28 = int_to_ptr.vmem [resolvable:$true] %s33_s28 }
   0x5   :  { %s737_s10 = smov 4   ;;  %s738_s11 = smov [#allocation8]  }
   0x6   :  { %39 = dma.hbm_to_vmem [thread:$0]  %s32_s26, 1024, %s34_s28, [#allocation6], %s736_s9, %s736_s9, %s737_s10  }
   0x7   :  { %s59_s12 = sshll.u32 %s738_s11, 4  ;;  %s21_s15 = sshll.u32 %s813_s0, 4  ;;  %s60_s12 = int_to_ptr.vmem [resolvable:$true] %s59_s12  ;;  %s22_s15 = int_to_ptr.hbm [resolvable:$true] %s21_s15 }
   0x8   :  { %65 = dma.hbm_to_vmem [thread:$0]  %s58_s8, 1024, %s60_s12, [#allocation9], %s736_s9, %s736_s9, %s737_s10  }
   0x9   :  { %s44_s17 = sshll.u32 %s815_s2, 4  ;;  %s739_s18 = smov [#allocation2]   ;;  %s45_s17 = int_to_ptr.hbm [resolvable:$true] %s44_s17 }
   0xa   :  { %s23_s19 = sshll.u32 %s739_s18, 4  ;;  %s740_s3 = smov [#allocation7]   ;;  %s24_s19 = int_to_ptr.vmem [resolvable:$true] %s23_s19 }
   0xb   :  { %26 = dma.hbm_to_vmem [thread:$0]  %s22_s15, 128, %s24_s19, [#allocation3]  }
   0xc   :  { %s46_s20 = sshll.u32 %s740_s3, 4  ;;  %s71_s23 = sshll.u32 %s817_s4, 4  ;;  %s47_s20 = int_to_ptr.vmem [resolvable:$true] %s46_s20  ;;  %s72_s23 = int_to_ptr.hbm [resolvable:$true] %s71_s23 }
   0xd   :  { %52 = dma.hbm_to_vmem [thread:$0]  %s45_s17, 1024, %s47_s20, [#allocation6], %s736_s9, %s736_s9, %s737_s10  }
   0xe   :  { %s741_s0 = smov [#allocation10]  }
   0xf   :  { %s73_s24 = sshll.u32 %s741_s0, 4  ;;  %s74_s24 = int_to_ptr.vmem [resolvable:$true] %s73_s24 }
  0x10   :  { %76 = dma.hbm_to_vmem [thread:$0]  %s72_s23, 16, %s74_s24, [#allocation9]  }
  0x11   :  { %727 = dma.done.wait [#allocation3], 128  }
  0x12   :  { %728 = vsyncadd [#allocation3], 4294967168 }
  0x13   :  { %729 = dma.done.wait [#allocation6], 2048  }
  0x14   :  { %730 = vsyncadd [#allocation6], 4294965248 }
  0x15   :  { %731 = dma.done.wait [#allocation9], 1040  }
  0x16   :  { %732 = vsyncadd [#allocation9], 4294966256  ;;  %v553_v0 = vld [vmem:[#allocation5 + $0x38] sm:$0xff]  ;;  %v552_v1 = vld [vmem:[#allocation5 + $0x30] sm:$0xff]  ;;  %s436_s11 = sshll.u32 %s820_s7, 4  ;;  %s437_s11 = int_to_ptr.hbm [resolvable:$true] %s436_s11 }
  0x17   :  { %167 = vmatpush.bf16.msra.mxu0 %v553_v0  ;;  %v551_v2 = vld [vmem:[#allocation5 + $0x28] sm:$0xff]  ;;  %v550_v3 = vld [vmem:[#allocation5 + $0x20] sm:$0xff]  ;;  %v549_v4 = vld [vmem:[#allocation5 + $0x18] sm:$0xff] }
  0x18   :  { %v548_v5 = vld [vmem:[#allocation5 + $0x10] sm:$0xff]  ;;  %v547_v6 = vld [vmem:[#allocation5 + $0x8] sm:$0xff]  ;;  %v546_v7 = vld [vmem:[#allocation5] sm:$0xff] }
  0x19   :  { %v101_v8 = vld [vmem:[#allocation2] sm:$0xff]  ;;  %v560_v11 = vld [vmem:[#allocation7 + $0x30] sm:$0xff]  ;;  %v559_v12 = vld [vmem:[#allocation7 + $0x28] sm:$0xff] }
  0x1a   :  { %v102_v9 = vpack.c.bf16 %v101_v8, %v101_v8  ;;  %v561_v10 = vld [vmem:[#allocation7 + $0x38] sm:$0xff]  ;;  %v558_v13 = vld [vmem:[#allocation7 + $0x20] sm:$0xff]  ;;  %v556_v18 = vld [vmem:[#allocation7 + $0x10] sm:$0xff] }
  0x1b   :  { %168 = vmatpush.bf16.msra.mxu0 %v552_v1  ;;  %288 = vmatpush.bf16.msra.mxu1 %v561_v10  ;;  %v557_v14 = vld [vmem:[#allocation7 + $0x18] sm:$0xff]  ;;  %v555_v23 = vld [vmem:[#allocation7 + $0x8] sm:$0xff]  ;;  %v554_v29 = vld [vmem:[#allocation7] sm:$0xff] }
  0x1c   :  { %v198_v44 = vld [vmem:[%s818_s5] sm:$0x1]  ;;  %v568_v58 = vld [vmem:[#allocation8 + $0x30] sm:$0xff]  ;;  %v567_v59 = vld [vmem:[#allocation8 + $0x28] sm:$0xff] }
  0x1d   :  { %v211_v48 = vld [vmem:[%s819_s6] sm:$0x1]  ;;  %v566_v60 = vld [vmem:[#allocation8 + $0x20] sm:$0xff]  ;;  %v564_v1 = vld [vmem:[#allocation8 + $0x10] sm:$0xff] }
  0x1e   :  { %v569_v57 = vld [vmem:[#allocation8 + $0x38] sm:$0xff] }
  0x1f   :  { %169 = vmatpush.bf16.msra.mxu0 %v551_v2  ;;  %289 = vmatpush.bf16.msra.mxu1 %v560_v11  ;;  %v565_v61 = vld [vmem:[#allocation8 + $0x18] sm:$0xff] }
  0x20   :  { %415 = vmatpush.bf16.msra.mxu2 %v569_v57 }
  0x23   :  { %170 = vmatpush.bf16.msra.mxu0 %v550_v3  ;;  %290 = vmatpush.bf16.msra.mxu1 %v559_v12  ;;  %v562_v12 = vld [vmem:[#allocation8] sm:$0xff] }
  0x24   :  { %416 = vmatpush.bf16.msra.mxu2 %v568_v58 }
  0x27   :  { %171 = vmatpush.bf16.msra.mxu0 %v549_v4  ;;  %291 = vmatpush.bf16.msra.mxu1 %v558_v13 }
  0x28   :  { %417 = vmatpush.bf16.msra.mxu2 %v567_v59 }
  0x2b   :  { %172 = vmatpush.bf16.msra.mxu0 %v548_v5  ;;  %292 = vmatpush.bf16.msra.mxu1 %v557_v14 }
  0x2c   :  { %418 = vmatpush.bf16.msra.mxu2 %v566_v60 }
  0x2f   :  { %173 = vmatpush.bf16.msra.mxu0 %v547_v6  ;;  %293 = vmatpush.bf16.msra.mxu1 %v556_v18  ;;  %v563_v6 = vld [vmem:[#allocation8 + $0x8] sm:$0xff] }
  0x30   :  { %419 = vmatpush.bf16.msra.mxu2 %v565_v61 }
  0x33   :  { %174 = vmatpush.bf16.msra.mxu0 %v546_v7  ;;  %294 = vmatpush.bf16.msra.mxu1 %v555_v23 }
  0x34   :  { %420 = vmatpush.bf16.msra.mxu2 %v564_v1 }
  0x36   :  { %175 = vmatmul.bf16.vlgmr.msra.gmra.mxu0 %v102_v9 }
  0x37   :  { %295 = vmatpush.bf16.msra.mxu1 %v554_v29 }
  0x38   :  { %421 = vmatpush.bf16.msra.mxu2 %v563_v6 }
  0x3c   :  { %422 = vmatpush.bf16.msra.mxu2 %v562_v12 }
  0xb3   :  { %v176_v15 = vpop.f32.mrf.mxu0 }
  0xb4   :  { %v180_v16 = vrot.slane %v176_v15, 4  ;;  %v187_v17 = vmul.f32 %v176_v15, %v176_v15 }
  0xb6   :  { %v181_v19 = vadd.f32 %v180_v16, %v176_v15  ;;  %v188_v20 = vrot.slane %v187_v17, 4 }
  0xb8   :  { %v182_v21 = vrot.slane %v181_v19, 2  ;;  %v189_v22 = vadd.f32 %v188_v20, %v187_v17 }
  0xba   :  { %v183_v24 = vadd.f32 %v182_v21, %v181_v19  ;;  %v190_v25 = vrot.slane %v189_v22, 2 }
  0xbb   :  { %v178_v26 = vpop.f32.mrf.mxu0 }
  0xbc   :  { %v184_v27 = vrot.slane %v183_v24, 1  ;;  %v191_v28 = vadd.f32 %v190_v25, %v189_v22 }
  0xbe   :  { %v192_v30 = vrot.slane %v191_v28, 1  ;;  %v185_v31 = vadd.f32 %v184_v27, %v183_v24  ;;  %v512_v27 = vld [vmem:[%s818_s5 + $0x1] sm:$0x1]  ;;  %s742_s5 = smov [#allocation11]  }
  0xbf   :  { %s434_s8 = sshll.u32 %s742_s5, 4  ;;  %s435_s8 = int_to_ptr.vmem [resolvable:$true] %s434_s8 }
  0xc0   :  { %v193_v32 = vadd.f32 %v192_v30, %v191_v28  ;;  %v186_v33 = vmul.f32 0.125, %v185_v31  ;;  %v513_v31 = vld [vmem:[%s819_s6 + $0x1] sm:$0x1] }
  0xc2   :  { %v194_v34 = vmul.f32 0.125, %v193_v32  ;;  %v195_v35 = vmul.f32 %v186_v33, %v186_v33 }
  0xc4   :  { %v196_v36 = vsub.f32 %v194_v34, %v195_v35 }
  0xc6   :  { %v197_v37 = vmax.f32 %v196_v36, 0.0 }
  0xc8   :  { %v199_v38 = vadd.f32 1e-05, %v197_v37 }
  0xca   :  { %579 = vrsqrt.f32 %v199_v38  ;;  %vm206_vm1 = vweird.f32 %v199_v38 }
  0xd0   :  { %v580_v39 = vpop.eup %579 }
  0xd1   :  { %v201_v40 = vmul.f32 %v580_v39, %v199_v38  ;;  %vm207_vm0 = vweird.f32 %v580_v39 }
  0xd2   :  { %vm208_vm2 = vmor %vm206_vm1, %vm207_vm0 }
  0xd3   :  { %v202_v41 = vmul.f32 %v580_v39, %v201_v40  ;;  %v578_v40 = vld [vmem:[#allocation10] ss:$0 sm:$0xff] }
  0xd5   :  { %v203_v42 = vmul.f32 0.5, %v202_v41 }
  0xd7   :  { %v204_v43 = vsub.f32 1.5, %v203_v42 }
  0xd9   :  { %v205_v45 = vmul.f32 %v580_v39, %v204_v43 }
  0xdb   :  { %v209_v46 = vsel %vm208_vm2, %v580_v39, %v205_v45 }
  0xdc   :  { %v210_v47 = vmul.f32 %v209_v46, %v198_v44 }
  0xde   :  { %v212_v49 = vmul.f32 %v210_v47, %v186_v33  ;;  %v215_v50 = vperm.slane %v210_v47, 0 }
  0xe0   :  { %v213_v51 = vsub.f32 %v211_v48, %v212_v49  ;;  %v217_v52 = vmul.f32 %v215_v50, %v176_v15 }
  0xe2   :  { %v219_v53 = vperm.slane %v213_v51, 0 }
  0xe4   :  { %v221_v54 = vadd.f32 %v219_v53, %v217_v52 }
  0xe6   :  { %v222_v55 = vmax.f32 %v221_v54, 0.0 }
  0xe8   :  { %v223_v56 = vpack.c.bf16 %v222_v55, %v222_v55 }
  0xea   :  { %296 = vmatmul.bf16.vlgmr.msra.gmra.mxu1 %v223_v56 }
 0x167   :  { %v297_v62 = vpop.f32.mrf.mxu1 }
 0x168   :  { %v301_v63 = vrot.slane %v297_v62, 4  ;;  %v308_v0 = vmul.f32 %v297_v62, %v297_v62 }
 0x16a   :  { %v302_v2 = vadd.f32 %v301_v63, %v297_v62  ;;  %v309_v3 = vrot.slane %v308_v0, 4 }
 0x16c   :  { %v303_v4 = vrot.slane %v302_v2, 2  ;;  %v310_v5 = vadd.f32 %v309_v3, %v308_v0 }
 0x16e   :  { %v304_v7 = vadd.f32 %v303_v4, %v302_v2  ;;  %v311_v8 = vrot.slane %v310_v5, 2 }
 0x16f   :  { %v299_v9 = vpop.f32.mrf.mxu1 }
 0x170   :  { %v305_v10 = vrot.slane %v304_v7, 1  ;;  %v312_v11 = vadd.f32 %v311_v8, %v310_v5 }
 0x172   :  { %v313_v13 = vrot.slane %v312_v11, 1  ;;  %v306_v14 = vadd.f32 %v305_v10, %v304_v7 }
 0x174   :  { %v314_v15 = vadd.f32 %v313_v13, %v312_v11  ;;  %v307_v16 = vmul.f32 0.125, %v306_v14 }
 0x176   :  { %v315_v17 = vmul.f32 0.125, %v314_v15  ;;  %v316_v18 = vmul.f32 %v307_v16, %v307_v16 }
 0x178   :  { %v317_v19 = vsub.f32 %v315_v17, %v316_v18 }
 0x17a   :  { %v318_v20 = vmax.f32 %v317_v19, 0.0 }
 0x17c   :  { %v321_v21 = vadd.f32 1e-05, %v318_v20 }
 0x17e   :  { %581 = vrsqrt.f32 %v321_v21  ;;  %vm328_vm4 = vweird.f32 %v321_v21 }
 0x184   :  { %v582_v22 = vpop.eup %581 }
 0x185   :  { %v323_v23 = vmul.f32 %v582_v22, %v321_v21  ;;  %vm329_vm3 = vweird.f32 %v582_v22 }
 0x186   :  { %vm330_vm5 = vmor %vm328_vm4, %vm329_vm3 }
 0x187   :  { %v324_v24 = vmul.f32 %v582_v22, %v323_v23 }
 0x189   :  { %v325_v25 = vmul.f32 0.5, %v324_v24 }
 0x18b   :  { %v326_v26 = vsub.f32 1.5, %v325_v25 }
 0x18d   :  { %v327_v28 = vmul.f32 %v582_v22, %v326_v26 }
 0x18f   :  { %v331_v29 = vsel %vm330_vm5, %v582_v22, %v327_v28 }
 0x190   :  { %v332_v30 = vmul.f32 %v512_v27, %v331_v29 }
 0x192   :  { %v335_v32 = vmul.f32 %v332_v30, %v307_v16  ;;  %v338_v33 = vperm.slane %v332_v30, 0 }
 0x194   :  { %v336_v34 = vsub.f32 %v513_v31, %v335_v32  ;;  %v340_v35 = vmul.f32 %v338_v33, %v297_v62 }
 0x196   :  { %v342_v36 = vperm.slane %v336_v34, 0 }
 0x198   :  { %v344_v37 = vadd.f32 %v342_v36, %v340_v35 }
 0x19a   :  { %v345_v38 = vmax.f32 %v344_v37, 0.0 }
 0x19c   :  { %v346_v39 = vpack.c.bf16 %v345_v38, %v345_v38 }
 0x19e   :  { %423 = vmatmul.bf16.vlgmr.msra.gmra.mxu2 %v346_v39 }
 0x221   :  { %v424_v41 = vpop.f32.mrf.mxu2 }
 0x222   :  { %v425_v42 = vadd.f32 %v578_v40, %v424_v41 }
 0x224   :  { %428 = vst [vmem:[#allocation11] sm:$0xff] %v425_v42 }
 0x225   :  { %439 = dma.vmem_to_hbm [thread:$0]  %s435_s8, 128, %s437_s11, [#allocation4]  }
 0x229   :  { %v426_v43 = vpop.f32.mrf.mxu2 }
 0x22a   :  { %733 = dma.done.wait [#allocation4], 128  }
 0x22b   :  { %734 = vsyncadd [#allocation4], 4294967168 }
 0x22c   :  { %444 = vsyncpa [#allocation3], 1 }
 0x22d   :  { %445 = vsyncpa [#allocation6], 1 }
 0x22e   :  { %446 = vsyncpa [#allocation9], 1 }
 0x22f   :  { %447 = vsyncpa [#allocation4], 1 }

</bundles_post_ra>
